<compile_context>
chip_gen: v5e
topology: v5e:2x2
jax: 0.10.0
libtpu: 0.0.40
codegen_flags: <defaults>
</compile_context>

<pallas_src>
import functools

import jax
import jax.numpy as jnp
from jax import lax
from jax.experimental import pallas as pl
from jax.experimental.pallas import tpu as pltpu

N_EMBD = 256
ATT_SIZE = 16
NUM_HEADS = 4


# ---------------------------------------------------------------------------
# Fused kernel: one grid step per block of Bt batch rows.
#   x_ref    : (Bt, L, D)        block of batch rows of x           (f32)
#   wqkv_ref : (D, Cp)           packed [Wq | Wk | Wv | 0-pad]      (compute dtype)
#   wp_ref   : (H*A, E)          output projection weight           (compute dtype)
#   bp_ref   : (1, E)            output projection bias             (f32)
#   o_ref    : (Bt, L, E)        final output block (lane-dense, E = 256)
#   acc_ref  : (Bt, L, H*A) f32  VMEM scratch for the head "concat"
# ---------------------------------------------------------------------------
def mha_fused_kernel(x_ref, wqkv_ref, wp_ref, bp_ref, o_ref, acc_ref, *,
                     num_heads, att_size, compute_dtype, approx_recip):
    Bt, L, D = x_ref.shape
    H, A = num_heads, att_size
    HA = H * A
    M = Bt * L

    # ---- packed QKV projection: one wide MXU matmul for all heads ----------
    x = x_ref[...].reshape(M, D).astype(compute_dtype)          # (M, D)
    qkv = jnp.dot(x, wqkv_ref[...],
                  preferred_element_type=jnp.float32)           # (M, Cp) f32
    qkv = qkv.astype(compute_dtype)                             # single cast

    # Regroup rows per batch element (leading-dim reshape only; last dim kept).
    q = qkv[:, 0:HA].reshape(Bt, L, HA)
    k = qkv[:, HA:2 * HA].reshape(Bt, L, HA)
    v = qkv[:, 2 * HA:3 * HA].reshape(Bt, L, HA)

    # Causal mask, shared across heads (hoisted out of the head loop).
    row = lax.broadcasted_iota(jnp.int32, (Bt, L, L), 1)
    col = lax.broadcasted_iota(jnp.int32, (Bt, L, L), 2)
    causal = row >= col

    # ---- per-head attention (H = 4, static unroll), batched over Bt rows ---
    for h in range(H):
        sl = slice(h * A, (h + 1) * A)
        qh = q[:, :, sl]                                        # (Bt, L, A)
        kh = k[:, :, sl]                                        # (Bt, L, A)
        vh = v[:, :, sl]                                        # (Bt, L, A)

        # scores = q @ k^T, contracting the A axis (no materialized transpose).
        # NOTE: no 1/sqrt(A) scaling, matching the reference module.
        s = jnp.einsum('bla,bma->blm', qh, kh,
                       preferred_element_type=jnp.float32)      # (Bt, L, L) f32
        s = jnp.where(causal, s, -jnp.inf)

        m = jnp.max(s, axis=-1, keepdims=True)
        e = jnp.exp(s - m)
        denom = jnp.sum(e, axis=-1, keepdims=True)
        w = e * pl.reciprocal(denom, approx=approx_recip)

        # Write this head's output straight into its lane slot ("concat").
        acc_ref[:, :, sl] = jnp.einsum('blm,bma->bla',
                                       w.astype(compute_dtype), vh,
                                       preferred_element_type=jnp.float32)

    # ---- output projection + bias ------------------------------------------
    cat = acc_ref[...].reshape(M, HA).astype(compute_dtype)     # (M, H*A)
    out = jnp.dot(cat, wp_ref[...],
                  preferred_element_type=jnp.float32)           # (M, E) f32
    out = out + bp_ref[...].astype(jnp.float32)                 # (1, E) broadcast
    o_ref[...] = out.reshape(Bt, L, -1).astype(o_ref.dtype)     # lane-dense store


def _pack_qkv(wq, wk, wv):
    """(H, D, A) x3 -> (D, Cp) with Cp = round_up(3*H*A, 128); zero pad columns.

    One-time weight prep: per-head column blocks [Wq_h | ... | Wk_h | ... | Wv_h].
    """
    def to2d(w):
        H, D, A = w.shape
        return jnp.transpose(w, (1, 0, 2)).reshape(D, H * A)

    packed = jnp.concatenate([to2d(wq), to2d(wk), to2d(wv)], axis=1)
    D, C = packed.shape
    Cp = ((C + 127) // 128) * 128
    if Cp != C:
        packed = jnp.pad(packed, ((0, 0), (0, Cp - C)))
    return packed


def _choose_block_rows(B, L, target_rows=512):
    """Pick Bt so that M = Bt*L is large (MXU-friendly) and Bt divides B."""
    bt = max(1, min(B, max(1, target_rows // max(L, 1))))
    while B % bt:
        bt -= 1
    return bt


def multi_head_attention(x, wq, wk, wv, wp, bp, *,
                         matmul_dtype=jnp.bfloat16, block_rows=None):
    """x: (B, L, D); wq/wk/wv: (H, D, A); wp: (H*A, E); bp: (E,)."""
    B, L, D = x.shape
    H, _, A = wq.shape
    E = wp.shape[1]
    HA = H * A

    # One-time weight prep: pack + cast to MXU operand dtype (halves weight DMA
    # in the bf16 default path).  Bias stays f32 (added after f32 accumulation).
    wqkv = _pack_qkv(wq, wk, wv).astype(matmul_dtype)   # (D, Cp)
    Cp = wqkv.shape[1]
    wp_c = wp.astype(matmul_dtype)                      # (H*A, E)
    bp2 = bp.reshape(1, E).astype(jnp.float32)

    Bt = block_rows if block_rows is not None else _choose_block_rows(B, L)
    assert B % Bt == 0, "block_rows must divide the batch size"
    grid = (B // Bt,)

    kernel = functools.partial(
        mha_fused_kernel,
        num_heads=H,
        att_size=A,
        compute_dtype=matmul_dtype,
        approx_recip=(matmul_dtype == jnp.bfloat16))

    out = pl.pallas_call(
        kernel,
        out_shape=jax.ShapeDtypeStruct((B, L, E), jnp.float32),
        grid_spec=pltpu.PrefetchScalarGridSpec(
            num_scalar_prefetch=0,
            grid=grid,
            in_specs=[
                pl.BlockSpec((Bt, L, D), lambda b: (b, 0, 0)),
                pl.BlockSpec((D, Cp), lambda b: (0, 0)),
                pl.BlockSpec((HA, E), lambda b: (0, 0)),
                pl.BlockSpec((1, E), lambda b: (0, 0)),
            ],
            out_specs=pl.BlockSpec((Bt, L, E), lambda b: (b, 0, 0)),
            scratch_shapes=[pltpu.VMEM((Bt, L, HA), jnp.float32)],
        ),
        compiler_params=pltpu.CompilerParams(
            dimension_semantics=("parallel",)),
    )(x, wqkv, wp_c, bp2)
    return out


def _reference(x, wq, wk, wv, wp, bp):
    """Pure-JAX reference of the eval-mode forward, for sanity checking."""
    B, L, D = x.shape
    outs = []
    for h in range(wq.shape[0]):
        q = x @ wq[h]
        k = x @ wk[h]
        v = x @ wv[h]
        s = q @ jnp.swapaxes(k, 1, 2)
        mask = jnp.tril(jnp.ones((L, L), dtype=bool))
        s = jnp.where(mask, s, -jnp.inf)
        w = jax.nn.softmax(s, axis=-1)
        outs.append(w @ v)
    cat = jnp.concatenate(outs, axis=-1)
    return cat @ wp + bp


if __name__ == "__main__":
    key = jax.random.PRNGKey(0)
    B, L = 2, 8
    k_x, k_q, k_k, k_v, k_p, k_b = jax.random.split(key, 6)

    x = jax.random.normal(k_x, (B, L, N_EMBD), dtype=jnp.float32)
    # per-head projection weights, stored transposed: (H, D, A)
    wq = jax.random.normal(k_q, (NUM_HEADS, N_EMBD, ATT_SIZE), jnp.float32) * 0.05
    wk = jax.random.normal(k_k, (NUM_HEADS, N_EMBD, ATT_SIZE), jnp.float32) * 0.05
    wv = jax.random.normal(k_v, (NUM_HEADS, N_EMBD, ATT_SIZE), jnp.float32) * 0.05
    # output projection: (H*A, E) and bias (E,)
    wp = jax.random.normal(k_p, (NUM_HEADS * ATT_SIZE, N_EMBD), jnp.float32) * 0.05
    bp = jax.random.normal(k_b, (N_EMBD,), jnp.float32) * 0.01

    ref = _reference(x, wq, wk, wv, wp, bp)

    # Exact-precision path (f32 MXU operands): tight match vs. reference.
    out_f32 = jax.block_until_ready(
        multi_head_attention(x, wq, wk, wv, wp, bp, matmul_dtype=jnp.float32))
    assert out_f32.shape == (B, L, N_EMBD)
    assert jnp.allclose(out_f32, ref, atol=1e-4, rtol=1e-4), "f32 mismatch vs reference"

    # Default fast path (bf16 MXU operands, f32 accumulation/softmax).
    out_bf16 = jax.block_until_ready(multi_head_attention(x, wq, wk, wv, wp, bp))
    assert out_bf16.shape == (B, L, N_EMBD)
    assert jnp.allclose(out_bf16, ref, atol=5e-2, rtol=5e-2), "bf16 mismatch vs reference"

    print("KERNEL_OK")
</pallas_src>

<mosaic_0001>
module attributes {stable_mosaic.version = 11 : i64} {
  func.func @mha_fused_kernel(%arg0: i32, %arg1: memref<2x8x256xf32, #tpu.memory_space<vmem>>, %arg2: memref<256x256xf32, #tpu.memory_space<vmem>>, %arg3: memref<64x256xf32, #tpu.memory_space<vmem>>, %arg4: memref<1x256xf32, #tpu.memory_space<vmem>>, %arg5: memref<2x8x256xf32, #tpu.memory_space<vmem>>, %arg6: memref<2x8x64xf32, #tpu.memory_space<vmem>>) attributes {dimension_semantics = [#tpu.dimension_semantics<parallel>], iteration_bounds = array<i64: 1>, scalar_prefetch = 0 : i64, scratch_operands = 1 : i64, tpu.core_type = #tpu.core_type<tc>, window_params = [{transform_indices = @transform_0, window_bounds = array<i64: 2, 8, 256>}, {pipeline_mode = #tpu.pipeline_mode<synchronous>, transform_indices = @transform_1, window_bounds = array<i64: 256, 256>}, {pipeline_mode = #tpu.pipeline_mode<synchronous>, transform_indices = @transform_2, window_bounds = array<i64: 64, 256>}, {pipeline_mode = #tpu.pipeline_mode<synchronous>, transform_indices = @transform_3, window_bounds = array<i64: 1, 256>}, {transform_indices = @transform_4, window_bounds = array<i64: 2, 8, 256>}]} {
    %c0 = arith.constant 0 : index
    %c0_0 = arith.constant 0 : index
    %c0_1 = arith.constant 0 : index
    %0 = vector.load %arg1[%c0, %c0_0, %c0_1] : memref<2x8x256xf32, #tpu.memory_space<vmem>>, vector<2x8x256xf32>
    %1 = vector.shape_cast %0 : vector<2x8x256xf32> to vector<16x256xf32>
    %c0_2 = arith.constant 0 : index
    %c0_3 = arith.constant 0 : index
    %2 = vector.load %arg2[%c0_2, %c0_3] : memref<256x256xf32, #tpu.memory_space<vmem>>, vector<256x256xf32>
    %cst = arith.constant dense<0.000000e+00> : vector<16x256xf32>
    %3 = tpu.matmul %1, %2, %cst {dimension_numbers = #tpu.dot_dimension_numbers<[1], [0], [0], [1], [0, 0, 1, 1], [], []>} : vector<16x256xf32>, vector<256x256xf32>, vector<16x256xf32> -> vector<16x256xf32>
    %4 = vector.extract_strided_slice %3 {offsets = [0, 0], sizes = [16, 64], strides = [1, 1]} : vector<16x256xf32> to vector<16x64xf32>
    %5 = vector.shape_cast %4 : vector<16x64xf32> to vector<2x8x64xf32>
    %6 = vector.extract_strided_slice %3 {offsets = [0, 64], sizes = [16, 64], strides = [1, 1]} : vector<16x256xf32> to vector<16x64xf32>
    %7 = vector.shape_cast %6 : vector<16x64xf32> to vector<2x8x64xf32>
    %8 = vector.extract_strided_slice %3 {offsets = [0, 128], sizes = [16, 64], strides = [1, 1]} : vector<16x256xf32> to vector<16x64xf32>
    %9 = vector.shape_cast %8 : vector<16x64xf32> to vector<2x8x64xf32>
    %10 = tpu.iota {dimensions = array<i32: 1>} : vector<2x8x8xi32>
    %11 = tpu.iota {dimensions = array<i32: 2>} : vector<2x8x8xi32>
    %12 = arith.cmpi sge, %10, %11 : vector<2x8x8xi32>
    %13 = vector.extract_strided_slice %5 {offsets = [0, 0, 0], sizes = [2, 8, 16], strides = [1, 1, 1]} : vector<2x8x64xf32> to vector<2x8x16xf32>
    %14 = vector.extract_strided_slice %7 {offsets = [0, 0, 0], sizes = [2, 8, 16], strides = [1, 1, 1]} : vector<2x8x64xf32> to vector<2x8x16xf32>
    %15 = vector.extract_strided_slice %9 {offsets = [0, 0, 0], sizes = [2, 8, 16], strides = [1, 1, 1]} : vector<2x8x64xf32> to vector<2x8x16xf32>
    "tpu.trace_start"() <{level = 10 : i32, message = "bla,bma->blm"}> : () -> ()
    %cst_4 = arith.constant dense<0.000000e+00> : vector<2x8x8xf32>
    %16 = tpu.matmul %13, %14, %cst_4 {dimension_numbers = #tpu.dot_dimension_numbers<[2], [2], [1], [1], [0, 0, 0, 1, 1, 1], [0], [0]>} : vector<2x8x16xf32>, vector<2x8x16xf32>, vector<2x8x8xf32> -> vector<2x8x8xf32>
    %cst_5 = arith.constant 0xFF800000 : f32
    "tpu.trace_stop"() : () -> ()
    %17 = vector.broadcast %cst_5 : f32 to vector<2x8x8xf32>
    %18 = arith.select %12, %16, %17 : vector<2x8x8xi1>, vector<2x8x8xf32>
    %cst_6 = arith.constant dense<0xFF800000> : vector<2x8xf32>
    %19 = vector.multi_reduction <maximumf>, %18, %cst_6 [2] : vector<2x8x8xf32> to vector<2x8xf32>
    %20 = vector.shape_cast %19 : vector<2x8xf32> to vector<2x8x1xf32>
    %21 = vector.broadcast %20 : vector<2x8x1xf32> to vector<2x8x8xf32>
    %22 = arith.subf %18, %21 : vector<2x8x8xf32>
    %23 = math.exp %22 : vector<2x8x8xf32>
    %cst_7 = arith.constant dense<0.000000e+00> : vector<2x8xf32>
    %24 = vector.multi_reduction <add>, %23, %cst_7 [2] : vector<2x8x8xf32> to vector<2x8xf32>
    %25 = vector.shape_cast %24 : vector<2x8xf32> to vector<2x8x1xf32>
    %26 = tpu.reciprocal %25 : vector<2x8x1xf32> -> vector<2x8x1xf32>
    %27 = vector.broadcast %26 : vector<2x8x1xf32> to vector<2x8x8xf32>
    %28 = arith.mulf %23, %27 : vector<2x8x8xf32>
    "tpu.trace_start"() <{level = 10 : i32, message = "blm,bma->bla"}> : () -> ()
    %cst_8 = arith.constant dense<0.000000e+00> : vector<2x8x16xf32>
    %29 = tpu.matmul %28, %15, %cst_8 {dimension_numbers = #tpu.dot_dimension_numbers<[2], [1], [1], [2], [0, 0, 0, 1, 1, 2], [0], [0]>} : vector<2x8x8xf32>, vector<2x8x16xf32>, vector<2x8x16xf32> -> vector<2x8x16xf32>
    "tpu.trace_stop"() : () -> ()
    %c0_9 = arith.constant 0 : index
    %c0_10 = arith.constant 0 : index
    %c0_11 = arith.constant 0 : index
    %30 = vector.load %arg6[%c0_9, %c0_10, %c0_11] : memref<2x8x64xf32, #tpu.memory_space<vmem>>, vector<2x8x16xf32>
    tpu.vector_store %arg6[%c0_9, %c0_10, %c0_11], %29 {strides = array<i32>} : memref<2x8x64xf32, #tpu.memory_space<vmem>>, vector<2x8x16xf32>,
    %31 = vector.extract_strided_slice %5 {offsets = [0, 0, 16], sizes = [2, 8, 16], strides = [1, 1, 1]} : vector<2x8x64xf32> to vector<2x8x16xf32>
    %32 = vector.extract_strided_slice %7 {offsets = [0, 0, 16], sizes = [2, 8, 16], strides = [1, 1, 1]} : vector<2x8x64xf32> to vector<2x8x16xf32>
    %33 = vector.extract_strided_slice %9 {offsets = [0, 0, 16], sizes = [2, 8, 16], strides = [1, 1, 1]} : vector<2x8x64xf32> to vector<2x8x16xf32>
    "tpu.trace_start"() <{level = 10 : i32, message = "bla,bma->blm"}> : () -> ()
    %cst_12 = arith.constant dense<0.000000e+00> : vector<2x8x8xf32>
    %34 = tpu.matmul %31, %32, %cst_12 {dimension_numbers = #tpu.dot_dimension_numbers<[2], [2], [1], [1], [0, 0, 0, 1, 1, 1], [0], [0]>} : vector<2x8x16xf32>, vector<2x8x16xf32>, vector<2x8x8xf32> -> vector<2x8x8xf32>
    %cst_13 = arith.constant 0xFF800000 : f32
    "tpu.trace_stop"() : () -> ()
    %35 = vector.broadcast %cst_13 : f32 to vector<2x8x8xf32>
    %36 = arith.select %12, %34, %35 : vector<2x8x8xi1>, vector<2x8x8xf32>
    %cst_14 = arith.constant dense<0xFF800000> : vector<2x8xf32>
    %37 = vector.multi_reduction <maximumf>, %36, %cst_14 [2] : vector<2x8x8xf32> to vector<2x8xf32>
    %38 = vector.shape_cast %37 : vector<2x8xf32> to vector<2x8x1xf32>
    %39 = vector.broadcast %38 : vector<2x8x1xf32> to vector<2x8x8xf32>
    %40 = arith.subf %36, %39 : vector<2x8x8xf32>
    %41 = math.exp %40 : vector<2x8x8xf32>
    %cst_15 = arith.constant dense<0.000000e+00> : vector<2x8xf32>
    %42 = vector.multi_reduction <add>, %41, %cst_15 [2] : vector<2x8x8xf32> to vector<2x8xf32>
    %43 = vector.shape_cast %42 : vector<2x8xf32> to vector<2x8x1xf32>
    %44 = tpu.reciprocal %43 : vector<2x8x1xf32> -> vector<2x8x1xf32>
    %45 = vector.broadcast %44 : vector<2x8x1xf32> to vector<2x8x8xf32>
    %46 = arith.mulf %41, %45 : vector<2x8x8xf32>
    "tpu.trace_start"() <{level = 10 : i32, message = "blm,bma->bla"}> : () -> ()
    %cst_16 = arith.constant dense<0.000000e+00> : vector<2x8x16xf32>
    %47 = tpu.matmul %46, %33, %cst_16 {dimension_numbers = #tpu.dot_dimension_numbers<[2], [1], [1], [2], [0, 0, 0, 1, 1, 2], [0], [0]>} : vector<2x8x8xf32>, vector<2x8x16xf32>, vector<2x8x16xf32> -> vector<2x8x16xf32>
    "tpu.trace_stop"() : () -> ()
    %c0_17 = arith.constant 0 : index
    %c0_18 = arith.constant 0 : index
    %c16 = arith.constant 16 : index
    %48 = vector.load %arg6[%c0_17, %c0_18, %c16] : memref<2x8x64xf32, #tpu.memory_space<vmem>>, vector<2x8x16xf32>
    tpu.vector_store %arg6[%c0_17, %c0_18, %c16], %47 {strides = array<i32>} : memref<2x8x64xf32, #tpu.memory_space<vmem>>, vector<2x8x16xf32>,
    %49 = vector.extract_strided_slice %5 {offsets = [0, 0, 32], sizes = [2, 8, 16], strides = [1, 1, 1]} : vector<2x8x64xf32> to vector<2x8x16xf32>
    %50 = vector.extract_strided_slice %7 {offsets = [0, 0, 32], sizes = [2, 8, 16], strides = [1, 1, 1]} : vector<2x8x64xf32> to vector<2x8x16xf32>
    %51 = vector.extract_strided_slice %9 {offsets = [0, 0, 32], sizes = [2, 8, 16], strides = [1, 1, 1]} : vector<2x8x64xf32> to vector<2x8x16xf32>
    "tpu.trace_start"() <{level = 10 : i32, message = "bla,bma->blm"}> : () -> ()
    %cst_19 = arith.constant dense<0.000000e+00> : vector<2x8x8xf32>
    %52 = tpu.matmul %49, %50, %cst_19 {dimension_numbers = #tpu.dot_dimension_numbers<[2], [2], [1], [1], [0, 0, 0, 1, 1, 1], [0], [0]>} : vector<2x8x16xf32>, vector<2x8x16xf32>, vector<2x8x8xf32> -> vector<2x8x8xf32>
    %cst_20 = arith.constant 0xFF800000 : f32
    "tpu.trace_stop"() : () -> ()
    %53 = vector.broadcast %cst_20 : f32 to vector<2x8x8xf32>
    %54 = arith.select %12, %52, %53 : vector<2x8x8xi1>, vector<2x8x8xf32>
    %cst_21 = arith.constant dense<0xFF800000> : vector<2x8xf32>
    %55 = vector.multi_reduction <maximumf>, %54, %cst_21 [2] : vector<2x8x8xf32> to vector<2x8xf32>
    %56 = vector.shape_cast %55 : vector<2x8xf32> to vector<2x8x1xf32>
    %57 = vector.broadcast %56 : vector<2x8x1xf32> to vector<2x8x8xf32>
    %58 = arith.subf %54, %57 : vector<2x8x8xf32>
    %59 = math.exp %58 : vector<2x8x8xf32>
    %cst_22 = arith.constant dense<0.000000e+00> : vector<2x8xf32>
    %60 = vector.multi_reduction <add>, %59, %cst_22 [2] : vector<2x8x8xf32> to vector<2x8xf32>
    %61 = vector.shape_cast %60 : vector<2x8xf32> to vector<2x8x1xf32>
    %62 = tpu.reciprocal %61 : vector<2x8x1xf32> -> vector<2x8x1xf32>
    %63 = vector.broadcast %62 : vector<2x8x1xf32> to vector<2x8x8xf32>
    %64 = arith.mulf %59, %63 : vector<2x8x8xf32>
    "tpu.trace_start"() <{level = 10 : i32, message = "blm,bma->bla"}> : () -> ()
    %cst_23 = arith.constant dense<0.000000e+00> : vector<2x8x16xf32>
    %65 = tpu.matmul %64, %51, %cst_23 {dimension_numbers = #tpu.dot_dimension_numbers<[2], [1], [1], [2], [0, 0, 0, 1, 1, 2], [0], [0]>} : vector<2x8x8xf32>, vector<2x8x16xf32>, vector<2x8x16xf32> -> vector<2x8x16xf32>
    "tpu.trace_stop"() : () -> ()
    %c0_24 = arith.constant 0 : index
    %c0_25 = arith.constant 0 : index
    %c32 = arith.constant 32 : index
    %66 = vector.load %arg6[%c0_24, %c0_25, %c32] : memref<2x8x64xf32, #tpu.memory_space<vmem>>, vector<2x8x16xf32>
    tpu.vector_store %arg6[%c0_24, %c0_25, %c32], %65 {strides = array<i32>} : memref<2x8x64xf32, #tpu.memory_space<vmem>>, vector<2x8x16xf32>,
    %67 = vector.extract_strided_slice %5 {offsets = [0, 0, 48], sizes = [2, 8, 16], strides = [1, 1, 1]} : vector<2x8x64xf32> to vector<2x8x16xf32>
    %68 = vector.extract_strided_slice %7 {offsets = [0, 0, 48], sizes = [2, 8, 16], strides = [1, 1, 1]} : vector<2x8x64xf32> to vector<2x8x16xf32>
    %69 = vector.extract_strided_slice %9 {offsets = [0, 0, 48], sizes = [2, 8, 16], strides = [1, 1, 1]} : vector<2x8x64xf32> to vector<2x8x16xf32>
    "tpu.trace_start"() <{level = 10 : i32, message = "bla,bma->blm"}> : () -> ()
    %cst_26 = arith.constant dense<0.000000e+00> : vector<2x8x8xf32>
    %70 = tpu.matmul %67, %68, %cst_26 {dimension_numbers = #tpu.dot_dimension_numbers<[2], [2], [1], [1], [0, 0, 0, 1, 1, 1], [0], [0]>} : vector<2x8x16xf32>, vector<2x8x16xf32>, vector<2x8x8xf32> -> vector<2x8x8xf32>
    %cst_27 = arith.constant 0xFF800000 : f32
    "tpu.trace_stop"() : () -> ()
    %71 = vector.broadcast %cst_27 : f32 to vector<2x8x8xf32>
    %72 = arith.select %12, %70, %71 : vector<2x8x8xi1>, vector<2x8x8xf32>
    %cst_28 = arith.constant dense<0xFF800000> : vector<2x8xf32>
    %73 = vector.multi_reduction <maximumf>, %72, %cst_28 [2] : vector<2x8x8xf32> to vector<2x8xf32>
    %74 = vector.shape_cast %73 : vector<2x8xf32> to vector<2x8x1xf32>
    %75 = vector.broadcast %74 : vector<2x8x1xf32> to vector<2x8x8xf32>
    %76 = arith.subf %72, %75 : vector<2x8x8xf32>
    %77 = math.exp %76 : vector<2x8x8xf32>
    %cst_29 = arith.constant dense<0.000000e+00> : vector<2x8xf32>
    %78 = vector.multi_reduction <add>, %77, %cst_29 [2] : vector<2x8x8xf32> to vector<2x8xf32>
    %79 = vector.shape_cast %78 : vector<2x8xf32> to vector<2x8x1xf32>
    %80 = tpu.reciprocal %79 : vector<2x8x1xf32> -> vector<2x8x1xf32>
    %81 = vector.broadcast %80 : vector<2x8x1xf32> to vector<2x8x8xf32>
    %82 = arith.mulf %77, %81 : vector<2x8x8xf32>
    "tpu.trace_start"() <{level = 10 : i32, message = "blm,bma->bla"}> : () -> ()
    %cst_30 = arith.constant dense<0.000000e+00> : vector<2x8x16xf32>
    %83 = tpu.matmul %82, %69, %cst_30 {dimension_numbers = #tpu.dot_dimension_numbers<[2], [1], [1], [2], [0, 0, 0, 1, 1, 2], [0], [0]>} : vector<2x8x8xf32>, vector<2x8x16xf32>, vector<2x8x16xf32> -> vector<2x8x16xf32>
    "tpu.trace_stop"() : () -> ()
    %c0_31 = arith.constant 0 : index
    %c0_32 = arith.constant 0 : index
    %c48 = arith.constant 48 : index
    %84 = vector.load %arg6[%c0_31, %c0_32, %c48] : memref<2x8x64xf32, #tpu.memory_space<vmem>>, vector<2x8x16xf32>
    tpu.vector_store %arg6[%c0_31, %c0_32, %c48], %83 {strides = array<i32>} : memref<2x8x64xf32, #tpu.memory_space<vmem>>, vector<2x8x16xf32>,
    %c0_33 = arith.constant 0 : index
    %c0_34 = arith.constant 0 : index
    %c0_35 = arith.constant 0 : index
    %85 = vector.load %arg6[%c0_33, %c0_34, %c0_35] : memref<2x8x64xf32, #tpu.memory_space<vmem>>, vector<2x8x64xf32>
    %86 = vector.shape_cast %85 : vector<2x8x64xf32> to vector<16x64xf32>
    %c0_36 = arith.constant 0 : index
    %c0_37 = arith.constant 0 : index
    %87 = vector.load %arg3[%c0_36, %c0_37] : memref<64x256xf32, #tpu.memory_space<vmem>>, vector<64x256xf32>
    %cst_38 = arith.constant dense<0.000000e+00> : vector<16x256xf32>
    %88 = tpu.matmul %86, %87, %cst_38 {dimension_numbers = #tpu.dot_dimension_numbers<[1], [0], [0], [1], [0, 0, 1, 1], [], []>} : vector<16x64xf32>, vector<64x256xf32>, vector<16x256xf32> -> vector<16x256xf32>
    %c0_39 = arith.constant 0 : index
    %c0_40 = arith.constant 0 : index
    %89 = vector.load %arg4[%c0_39, %c0_40] : memref<1x256xf32, #tpu.memory_space<vmem>>, vector<1x256xf32>
    %90 = vector.broadcast %89 : vector<1x256xf32> to vector<16x256xf32>
    %91 = arith.addf %88, %90 : vector<16x256xf32>
    %92 = vector.shape_cast %91 : vector<16x256xf32> to vector<2x8x256xf32>
    %c0_41 = arith.constant 0 : index
    %c0_42 = arith.constant 0 : index
    %c0_43 = arith.constant 0 : index
    %93 = vector.load %arg5[%c0_41, %c0_42, %c0_43] : memref<2x8x256xf32, #tpu.memory_space<vmem>>, vector<2x8x256xf32>
    tpu.vector_store %arg5[%c0_41, %c0_42, %c0_43], %92 {strides = array<i32>} : memref<2x8x256xf32, #tpu.memory_space<vmem>>, vector<2x8x256xf32>,
    return
  }
  func.func @transform_0(%arg0: i32) -> (i32, i32, i32) {
    %c0_i32 = arith.constant 0 : i32
    %c0_i32_0 = arith.constant 0 : i32
    %c0_i32_1 = arith.constant 0 : i32
    return %arg0, %c0_i32, %c0_i32_0 : i32, i32, i32
  }
  func.func @transform_1(%arg0: i32) -> (i32, i32) {
    %c0_i32 = arith.constant 0 : i32
    %c0_i32_0 = arith.constant 0 : i32
    %c0_i32_1 = arith.constant 0 : i32
    return %c0_i32, %c0_i32_0 : i32, i32
  }
  func.func @transform_2(%arg0: i32) -> (i32, i32) {
    %c0_i32 = arith.constant 0 : i32
    %c0_i32_0 = arith.constant 0 : i32
    %c0_i32_1 = arith.constant 0 : i32
    return %c0_i32, %c0_i32_0 : i32, i32
  }
  func.func @transform_3(%arg0: i32) -> (i32, i32) {
    %c0_i32 = arith.constant 0 : i32
    %c0_i32_0 = arith.constant 0 : i32
    %c0_i32_1 = arith.constant 0 : i32
    return %c0_i32, %c0_i32_0 : i32, i32
  }
  func.func @transform_4(%arg0: i32) -> (i32, i32, i32) {
    %c0_i32 = arith.constant 0 : i32
    %c0_i32_0 = arith.constant 0 : i32
    %c0_i32_1 = arith.constant 0 : i32
    return %arg0, %c0_i32, %c0_i32_0 : i32, i32, i32
  }
}

</mosaic_0001>

<bundles_post_ra>
// kernel: tpu_custom_call.1
= control target key start
LH: loop header
LB: loop body
LE: loop exit
PB: predicated region body
PF: predicated region fallthrough
CT: control target
= control target key end

     0   :  { %9 = vsyncpa [#allocation4], 0  ;;  %s1461_s0 = inlined_call_operand.hbm [shape: f32[2,8,256], index: 0, kind: input, shape index: {}]   ;;  %s1462_s1 = inlined_call_operand.hbm [shape: f32[256,256], index: 1, kind: input, shape index: {}]   ;;  %s1463_s2 = inlined_call_operand.hbm [shape: f32[64,256], index: 2, kind: input, shape index: {}]   ;;  %s1464_s3 = inlined_call_operand.vmem [shape: f32[1,256], index: 3, kind: input, shape index: {}]   ;;  %s1465_s4 = inlined_call_operand.hbm [shape: f32[2,8,256], index: 4, kind: output, shape index: {}]  }
   0x1   :  { %10 = vsyncpa [#allocation7], 0 }
   0x2   :  { %11 = vsyncpa [#allocation5], 0  ;;  %s29_s17 = sshll.u32 %s1462_s1, 4  ;;  %s1173_s18 = smov [#allocation6]   ;;  %s30_s17 = int_to_ptr.hbm [resolvable:$true] %s29_s17 }
   0x3   :  { %s31_s19 = sshll.u32 %s1173_s18, 4  ;;  %s16_s22 = sshll.u32 %s1461_s0, 4  ;;  %s32_s19 = int_to_ptr.vmem [resolvable:$true] %s31_s19  ;;  %s17_s22 = int_to_ptr.hbm [resolvable:$true] %s16_s22 }
   0x4   :  { %s1174_s23 = smov 256   ;;  %s1175_s24 = smov 16  }
   0x5   :  { %37 = dma.hbm_to_vmem [thread:$0]  %s30_s17, 8192, %s32_s19, [#allocation7], %s1174_s23, %s1174_s23, %s1175_s24  }
   0x6   :  { %s1176_s25 = smov [#allocation3]   ;;  %s42_s1 = sshll.u32 %s1463_s2, 4  ;;  %s43_s1 = int_to_ptr.hbm [resolvable:$true] %s42_s1 }
   0x7   :  { %s18_s26 = sshll.u32 %s1176_s25, 4  ;;  %s1177_s0 = smov [#allocation8]   ;;  %s19_s26 = int_to_ptr.vmem [resolvable:$true] %s18_s26 }
   0x8   :  { %24 = dma.hbm_to_vmem [thread:$0]  %s17_s22, 512, %s19_s26, [#allocation4], %s1174_s23, %s1174_s23, %s1175_s24  }
   0x9   :  { %s44_s29 = sshll.u32 %s1177_s0, 4  ;;  %s45_s29 = int_to_ptr.vmem [resolvable:$true] %s44_s29 }
   0xa   :  { %50 = dma.hbm_to_vmem [thread:$0]  %s43_s1, 2048, %s45_s29, [#allocation7], %s1174_s23, %s1174_s23, %s1175_s24  }
   0xb   :  { %1167 = dma.done.wait [#allocation4], 512  }
   0xc   :  { %1168 = vsyncadd [#allocation4], 4294966784 }
   0xd   :  { %1169 = dma.done.wait [#allocation7], 10240  }
   0xe   :  { %1170 = vsyncadd [#allocation7], 4294957056  ;;  %v99_v0 = vld [vmem:[#allocation6 + $0xf0] sm:$0xff]  ;;  %v97_v2 = vld [vmem:[#allocation6 + $0xe0] sm:$0xff]  ;;  %s1178_s2 = smov 32   ;;  %s1179_s30 = smov 48  }
   0xf   :  { %v131_v1 = vld [vmem:[#allocation6 + $0x1f0] sm:$0xff]  ;;  %133 = vmatpush.msra.mxu0 %v99_v0  ;;  %v129_v3 = vld [vmem:[#allocation6 + $0x1e0] sm:$0xff]  ;;  %v1230_v33 = vld [vmem:[#allocation3 + $0x8] sm:$0xff]  ;;  %s1180_s5 = smov 64   ;;  %s1181_s6 = smov 112   ;;  %vm233_vm0 = vcmask 130048  }
  0x10   :  { %156 = vmatpush.msra.mxu1 %v131_v1  ;;  %v95_v4 = vld [vmem:[#allocation6 + $0xd0] sm:$0xff]  ;;  %v93_v6 = vld [vmem:[#allocation6 + $0xc0] sm:$0xff]  ;;  %v1236_v35 = vld [vmem:[#allocation3 + $0x18] sm:$0xff]  ;;  %s1182_s7 = smov 96   ;;  %s1183_s8 = smov 80   ;;  %vm287_vm2 = vcmask 64512  }
  0x11   :  { %v127_v5 = vld [vmem:[#allocation6 + $0x1d0] sm:$0xff]  ;;  %134 = vmatpush.msra.mxu0 %v97_v2  ;;  %v125_v7 = vld [vmem:[#allocation6 + $0x1c0] sm:$0xff]  ;;  %v100_v39 = vld [vmem:[#allocation6 + $0xf8] sm:$0xff]  ;;  %s1184_s11 = smov [#allocation9]   ;;  %s980_s15 = sshll.u32 %s1465_s4, 4  ;;  %s981_s15 = int_to_ptr.hbm [resolvable:$true] %s980_s15 }
  0x12   :  { %157 = vmatpush.msra.mxu1 %v129_v3  ;;  %v91_v8 = vld [vmem:[#allocation6 + $0xb0] sm:$0xff]  ;;  %v89_v10 = vld [vmem:[#allocation6 + $0xa0] sm:$0xff]  ;;  %v98_v40 = vld [vmem:[#allocation6 + $0xe8] sm:$0xff]  ;;  %179 = vmatpush.msra.mxu2 %v100_v39  ;;  %s978_s12 = sshll.u32 %s1184_s11, 4  ;;  %s979_s12 = int_to_ptr.vmem [resolvable:$true] %s978_s12 }
  0x13   :  { %135 = vmatpush.msra.mxu0 %v95_v4  ;;  %v123_v9 = vld [vmem:[#allocation6 + $0x1b0] sm:$0xff]  ;;  %v121_v11 = vld [vmem:[#allocation6 + $0x1a0] sm:$0xff]  ;;  %v132_v41 = vld [vmem:[#allocation6 + $0x1f8] sm:$0xff] }
  0x14   :  { %158 = vmatpush.msra.mxu1 %v127_v5  ;;  %v87_v12 = vld [vmem:[#allocation6 + $0x90] sm:$0xff]  ;;  %v85_v14 = vld [vmem:[#allocation6 + $0x80] sm:$0xff]  ;;  %v130_v42 = vld [vmem:[#allocation6 + $0x1e8] sm:$0xff]  ;;  %202 = vmatpush.msra.mxu3 %v132_v41 }
  0x15   :  { %136 = vmatpush.msra.mxu0 %v93_v6  ;;  %v119_v13 = vld [vmem:[#allocation6 + $0x190] sm:$0xff]  ;;  %v117_v15 = vld [vmem:[#allocation6 + $0x180] sm:$0xff]  ;;  %v96_v43 = vld [vmem:[#allocation6 + $0xd8] sm:$0xff]  ;;  %180 = vmatpush.msra.mxu2 %v98_v40 }
  0x16   :  { %159 = vmatpush.msra.mxu1 %v125_v7  ;;  %v83_v16 = vld [vmem:[#allocation6 + $0x70] sm:$0xff]  ;;  %v81_v18 = vld [vmem:[#allocation6 + $0x60] sm:$0xff]  ;;  %v128_v44 = vld [vmem:[#allocation6 + $0x1d8] sm:$0xff]  ;;  %203 = vmatpush.msra.mxu3 %v130_v42 }
  0x17   :  { %137 = vmatpush.msra.mxu0 %v91_v8  ;;  %v115_v17 = vld [vmem:[#allocation6 + $0x170] sm:$0xff]  ;;  %v113_v19 = vld [vmem:[#allocation6 + $0x160] sm:$0xff]  ;;  %181 = vmatpush.msra.mxu2 %v96_v43  ;;  %v94_v48 = vld [vmem:[#allocation6 + $0xc8] sm:$0xff] }
  0x18   :  { %160 = vmatpush.msra.mxu1 %v123_v9  ;;  %v79_v20 = vld [vmem:[#allocation6 + $0x50] sm:$0xff]  ;;  %v77_v22 = vld [vmem:[#allocation6 + $0x40] sm:$0xff]  ;;  %204 = vmatpush.msra.mxu3 %v128_v44  ;;  %v126_v49 = vld [vmem:[#allocation6 + $0x1c8] sm:$0xff] }
  0x19   :  { %138 = vmatpush.msra.mxu0 %v89_v10  ;;  %v111_v21 = vld [vmem:[#allocation6 + $0x150] sm:$0xff]  ;;  %v109_v23 = vld [vmem:[#allocation6 + $0x140] sm:$0xff]  ;;  %v92_v50 = vld [vmem:[#allocation6 + $0xb8] sm:$0xff]  ;;  %182 = vmatpush.msra.mxu2 %v94_v48 }
  0x1a   :  { %161 = vmatpush.msra.mxu1 %v121_v11  ;;  %v75_v24 = vld [vmem:[#allocation6 + $0x30] sm:$0xff]  ;;  %v73_v26 = vld [vmem:[#allocation6 + $0x20] sm:$0xff]  ;;  %v124_v51 = vld [vmem:[#allocation6 + $0x1b8] sm:$0xff]  ;;  %205 = vmatpush.msra.mxu3 %v126_v49 }
  0x1b   :  { %139 = vmatpush.msra.mxu0 %v87_v12  ;;  %v107_v25 = vld [vmem:[#allocation6 + $0x130] sm:$0xff]  ;;  %v105_v27 = vld [vmem:[#allocation6 + $0x120] sm:$0xff]  ;;  %v90_v52 = vld [vmem:[#allocation6 + $0xa8] sm:$0xff]  ;;  %183 = vmatpush.msra.mxu2 %v92_v50 }
  0x1c   :  { %162 = vmatpush.msra.mxu1 %v119_v13  ;;  %v71_v28 = vld [vmem:[#allocation6 + $0x10] sm:$0xff]  ;;  %v69_v30 = vld [vmem:[#allocation6] sm:$0xff]  ;;  %v122_v53 = vld [vmem:[#allocation6 + $0x1a8] sm:$0xff]  ;;  %206 = vmatpush.msra.mxu3 %v124_v51 }
  0x1d   :  { %140 = vmatpush.msra.mxu0 %v85_v14  ;;  %v103_v29 = vld [vmem:[#allocation6 + $0x110] sm:$0xff]  ;;  %v101_v31 = vld [vmem:[#allocation6 + $0x100] sm:$0xff]  ;;  %v88_v54 = vld [vmem:[#allocation6 + $0x98] sm:$0xff]  ;;  %184 = vmatpush.msra.mxu2 %v90_v52 }
  0x1e   :  { %163 = vmatpush.msra.mxu1 %v117_v15  ;;  %v1228_v32 = vld [vmem:[#allocation3] sm:$0xff]  ;;  %v1234_v34 = vld [vmem:[#allocation3 + $0x10] sm:$0xff]  ;;  %v86_v55 = vld [vmem:[#allocation6 + $0x88] sm:$0xff]  ;;  %207 = vmatpush.msra.mxu3 %v122_v53 }
  0x1f   :  { %141 = vmatpush.msra.mxu0 %v83_v16  ;;  %185 = vmatpush.msra.mxu2 %v88_v54  ;;  %v120_v56 = vld [vmem:[#allocation6 + $0x198] sm:$0xff]  ;;  %v118_v58 = vld [vmem:[#allocation6 + $0x188] sm:$0xff] }
  0x20   :  { %164 = vmatpush.msra.mxu1 %v115_v17  ;;  %v84_v57 = vld [vmem:[#allocation6 + $0x78] sm:$0xff]  ;;  %208 = vmatpush.msra.mxu3 %v120_v56  ;;  %v82_v59 = vld [vmem:[#allocation6 + $0x68] sm:$0xff] }
  0x21   :  { %142 = vmatpush.msra.mxu0 %v81_v18  ;;  %186 = vmatpush.msra.mxu2 %v86_v55  ;;  %v116_v60 = vld [vmem:[#allocation6 + $0x178] sm:$0xff]  ;;  %v114_v61 = vld [vmem:[#allocation6 + $0x168] sm:$0xff] }
  0x22   :  { %165 = vmatpush.msra.mxu1 %v113_v19  ;;  %209 = vmatpush.msra.mxu3 %v118_v58  ;;  %v80_v62 = vld [vmem:[#allocation6 + $0x58] sm:$0xff]  ;;  %v78_v0 = vld [vmem:[#allocation6 + $0x48] sm:$0xff] }
  0x23   :  { %143 = vmatpush.msra.mxu0 %v79_v20  ;;  %187 = vmatpush.msra.mxu2 %v84_v57  ;;  %v112_v63 = vld [vmem:[#allocation6 + $0x158] sm:$0xff]  ;;  %v110_v1 = vld [vmem:[#allocation6 + $0x148] sm:$0xff] }
  0x24   :  { %166 = vmatpush.msra.mxu1 %v111_v21  ;;  %210 = vmatpush.msra.mxu3 %v116_v60  ;;  %v76_v2 = vld [vmem:[#allocation6 + $0x38] sm:$0xff]  ;;  %v74_v4 = vld [vmem:[#allocation6 + $0x28] sm:$0xff] }
  0x25   :  { %144 = vmatpush.msra.mxu0 %v77_v22  ;;  %188 = vmatpush.msra.mxu2 %v82_v59  ;;  %v108_v3 = vld [vmem:[#allocation6 + $0x138] sm:$0xff]  ;;  %v106_v5 = vld [vmem:[#allocation6 + $0x128] sm:$0xff] }
  0x26   :  { %167 = vmatpush.msra.mxu1 %v109_v23  ;;  %211 = vmatpush.msra.mxu3 %v114_v61  ;;  %v72_v6 = vld [vmem:[#allocation6 + $0x18] sm:$0xff]  ;;  %v70_v8 = vld [vmem:[#allocation6 + $0x8] sm:$0xff] }
  0x27   :  { %145 = vmatpush.msra.mxu0 %v75_v24  ;;  %189 = vmatpush.msra.mxu2 %v80_v62  ;;  %v104_v7 = vld [vmem:[#allocation6 + $0x118] sm:$0xff]  ;;  %v102_v9 = vld [vmem:[#allocation6 + $0x108] sm:$0xff] }
  0x28   :  { %168 = vmatpush.msra.mxu1 %v107_v25  ;;  %212 = vmatpush.msra.mxu3 %v112_v63 }
  0x29   :  { %146 = vmatpush.msra.mxu0 %v73_v26  ;;  %190 = vmatpush.msra.mxu2 %v78_v0 }
  0x2a   :  { %169 = vmatpush.msra.mxu1 %v105_v27  ;;  %213 = vmatpush.msra.mxu3 %v110_v1 }
  0x2b   :  { %147 = vmatpush.msra.mxu0 %v71_v28  ;;  %191 = vmatpush.msra.mxu2 %v76_v2 }
  0x2c   :  { %170 = vmatpush.msra.mxu1 %v103_v29  ;;  %214 = vmatpush.msra.mxu3 %v108_v3 }
  0x2d   :  { %148 = vmatpush.msra.mxu0 %v69_v30  ;;  %192 = vmatpush.msra.mxu2 %v74_v4  ;;  %v225_v30 = vlaneseq }
  0x2e   :  { %171 = vmatpush.msra.mxu1 %v101_v31  ;;  %149 = vmatmul.f32.vlgmr.msra.gmra.mxu0 %v1228_v32 }
  0x2f   :  { %172 = vmatmul.f32.vlgmr.msra.gmra.mxu1 %v1230_v33  ;;  %215 = vmatpush.msra.mxu3 %v106_v5  ;;  %v226_v31 = vshrl.u32 %v225_v30, 7 }
  0x30   :  { %193 = vmatpush.msra.mxu2 %v72_v6 }
  0x31   :  { %216 = vmatpush.msra.mxu3 %v104_v7 }
  0x32   :  { %194 = vmatpush.msra.mxu2 %v70_v8 }
  0x33   :  { %217 = vmatpush.msra.mxu3 %v102_v9  ;;  %195 = vmatmul.f32.vlgmr.msra.gmra.mxu2 %v1228_v32  ;;  %v228_v32 = vand.u32 127, %v225_v30 }
  0x34   :  { %218 = vmatmul.f32.vlgmr.msra.gmra.mxu3 %v1230_v33 }
  0x35   :  { %vm1298_vm1 = vcmp.ge.s32.totalorder %v226_v31, %v228_v32 }
  0x36   :  { %152 = vmatmul.f32.gmra.mxu0 %v1234_v34 }
  0x37   :  { %175 = vmatmul.f32.gmra.mxu1 %v1236_v35 }
  0x3b   :  { %198 = vmatmul.f32.gmra.mxu2 %v1234_v34 }
  0x3c   :  { %221 = vmatmul.f32.gmra.mxu3 %v1236_v35 }
  0xab   :  { %v150_v36 = vpop.f32.mrf.mxu0 }
  0xac   :  { %v173_v37 = vpop.f32.mrf.mxu1 }
  0xad   :  { %v1240_v38 = vadd.f32 %v173_v37, %v150_v36 }
  0xaf   :  { %557 = vrot.lane.b32.xlu2 %v1240_v38, %s1178_s2  ;;  %386 = vrot.lane.b32.xlu1 %v1240_v38, %s1179_s30 }
  0xb0   :  { %231 = vrot.lane.b32.xlu0 %v1240_v38, %s1180_s5 }
  0xb3   :  { %v153_v45 = vpop.f32.mrf.mxu0 }
  0xb4   :  { %v176_v46 = vpop.f32.mrf.mxu1 }
  0xb5   :  { %v1247_v47 = vadd.f32 %v176_v46, %v153_v45 }
  0xb6   :  { %v196_v24 = vpop.f32.mrf.mxu2 }
  0xb7   :  { %384 = vrot.lane.b32.xlu1 %v1240_v38, %s1181_s6  ;;  %414 = vrot.lane.b32.xlu2 %v1247_v47, %s1179_s30  ;;  %v219_v25 = vpop.f32.mrf.mxu3 }
  0xb8   :  { %259 = vrot.lane.b32.xlu0 %v1247_v47, %s1180_s5  ;;  %v1292_v26 = vadd.f32 %v219_v25, %v196_v24 }
  0xbe   :  { %v199_v27 = vpop.f32.mrf.mxu2 }
  0xbf   :  { %555 = vrot.lane.b32.xlu1 %v1240_v38, %s1182_s7  ;;  %585 = vrot.lane.b32.xlu2 %v1247_v47, %s1178_s2  ;;  %v222_v28 = vpop.f32.mrf.mxu3 }
  0xc0   :  { %412 = vrot.lane.b32.xlu0 %v1247_v47, %s1181_s6  ;;  %v1295_v29 = vadd.f32 %v222_v28, %v199_v27 }
  0xc2   :  { %v1034_v58 = vpack.i.bf16 %v1295_v29, %v1292_v26 }
  0xc7   :  { %583 = vrot.lane.b32.xlu1 %v1247_v47, %s1182_s7  ;;  %724 = vrot.lane.b32.xlu2 %v1240_v38, %s1183_s8 }
  0xc8   :  { %726 = vrot.lane.b32.xlu0 %v1240_v38, %s1175_s24 }
  0xcf   :  { %752 = vrot.lane.b32.xlu1 %v1247_v47, %s1183_s8 }
  0xd0   :  { %754 = vrot.lane.b32.xlu0 %v1247_v47, %s1175_s24 }
 0x109   :  { %v558_v10 = vpop.permute.xlu2 %557 }
 0x111   :  { %v415_v11 = vpop.permute.xlu2 %414 }
 0x112   :  { %1002 = vmatpush.xpose.msk.msrb.mxu1 %vm233_vm0, %v415_v11 }
 0x119   :  { %v586_v12 = vpop.permute.xlu2 %585 }
 0x11a   :  { %1008 = vmatpush.xpose.msk.msra.mxu1 %vm233_vm0, %v586_v12 }
 0x121   :  { %v387_v13 = vpop.permute.xlu1 %386  ;;  %v725_v21 = vpop.permute.xlu2 %724 }
 0x122   :  { %v232_v14 = vpop.permute.xlu0 %231  ;;  %1000 = vmatpush.xpose.msk.msrb.mxu0 %vm233_vm0, %v387_v13 }
 0x123   :  { %994 = vmatpush.xpose.msk.msrb.mxu2 %vm233_vm0, %v232_v14 }
 0x126   :  { %1006 = vmatpush.xpose.msk.msra.mxu0 %vm233_vm0, %v558_v10  ;;  %995 = vmatmul.msk.f32.vlgmr.msrb.gmra.mxu2 %vm233_vm0, %v1240_v38 }
 0x127   :  { %354 = vmatpush.msra.mxu2 %v1292_v26 }
 0x129   :  { %v385_v15 = vpop.permute.xlu1 %384 }
 0x12a   :  { %v260_v16 = vpop.permute.xlu0 %259  ;;  %1001 = vmatmul.msk.f32.vlgmr.msrb.gmra.mxu0 %vm233_vm0, %v385_v15 }
 0x12b   :  { %996 = vmatpush.xpose.msk.msrb.mxu3 %vm233_vm0, %v260_v16 }
 0x12e   :  { %997 = vmatmul.msk.f32.vlgmr.msrb.gmra.mxu3 %vm233_vm0, %v1247_v47 }
 0x12f   :  { %377 = vmatpush.msra.mxu3 %v1295_v29 }
 0x131   :  { %v556_v17 = vpop.permute.xlu1 %555 }
 0x132   :  { %v413_v18 = vpop.permute.xlu0 %412  ;;  %1007 = vmatmul.msk.f32.vlgmr.msra.gmra.mxu0 %vm233_vm0, %v556_v17 }
 0x133   :  { %1003 = vmatmul.msk.f32.vlgmr.msrb.gmra.mxu1 %vm233_vm0, %v413_v18 }
 0x139   :  { %v584_v19 = vpop.permute.xlu1 %583 }
 0x13a   :  { %v727_v20 = vpop.permute.xlu0 %726 }
 0x13b   :  { %1009 = vmatmul.msk.f32.vlgmr.msra.gmra.mxu1 %vm233_vm0, %v584_v19  ;;  %1012 = vmatpush.xpose.msk.msrb.mxu0 %vm233_vm0, %v727_v20 }
 0x13e   :  { %1013 = vmatmul.msk.f32.vlgmr.msrb.gmra.mxu0 %vm233_vm0, %v725_v21 }
 0x141   :  { %v753_v23 = vpop.permute.xlu1 %752 }
 0x142   :  { %v755_v22 = vpop.permute.xlu0 %754 }
 0x143   :  { %1014 = vmatpush.xpose.msk.msrb.mxu1 %vm233_vm0, %v755_v22 }
 0x146   :  { %1015 = vmatmul.msk.f32.vlgmr.msrb.gmra.mxu1 %vm233_vm0, %v753_v23 }
 0x1a7   :  { %v409_v34 = vpop.f32.mrf.mxu0 }
 0x1a8   :  { %v440_v35 = vsel %vm1298_vm1, %v409_v34, -inf }
 0x1a9   :  { %v255_v36 = vpop.f32.mrf.mxu2  ;;  %v442_v37 = vsel %vm287_vm2, %v440_v35, -inf }
 0x1aa   :  { %v285_v38 = vsel %vm1298_vm1, %v255_v36, -inf  ;;  %443 = vmax.xlane.f32.xlu1 %v442_v37 }
 0x1ab   :  { %v288_v39 = vsel %vm287_vm2, %v285_v38, -inf }
 0x1ac   :  { %289 = vmax.xlane.f32.xlu2 %v288_v39 }
 0x1af   :  { %v580_v45 = vpop.f32.mrf.mxu0 }
 0x1b0   :  { %v437_v40 = vpop.f32.mrf.mxu1  ;;  %v611_v47 = vsel %vm1298_vm1, %v580_v45, -inf }
 0x1b1   :  { %v441_v41 = vsel %vm1298_vm1, %v437_v40, -inf  ;;  %v282_v42 = vpop.f32.mrf.mxu3  ;;  %v613_v52 = vsel %vm287_vm2, %v611_v47, -inf }
 0x1b2   :  { %v286_v43 = vsel %vm1298_vm1, %v282_v42, -inf  ;;  %v445_v44 = vsel %vm287_vm2, %v441_v41, -inf }
 0x1b3   :  { %v291_v46 = vsel %vm287_vm2, %v286_v43, -inf }
 0x1b4   :  { %292 = vmax.xlane.f32.xlu0 %v291_v46  ;;  %446 = vmax.xlane.f32.xlu2 %v445_v44 }
 0x1b8   :  { %v608_v48 = vpop.f32.mrf.mxu1 }
 0x1b9   :  { %v612_v49 = vsel %vm1298_vm1, %v608_v48, -inf }
 0x1ba   :  { %v616_v50 = vsel %vm287_vm2, %v612_v49, -inf }
 0x1bb   :  { %v749_v51 = vpop.f32.mrf.mxu0 }
 0x1bc   :  { %v780_v53 = vsel %vm1298_vm1, %v749_v51, -inf  ;;  %617 = vmax.xlane.f32.xlu0 %v616_v50  ;;  %614 = vmax.xlane.f32.xlu2 %v613_v52 }
 0x1bd   :  { %v782_v54 = vsel %vm287_vm2, %v780_v53, -inf }
 0x1be   :  { %783 = vmax.xlane.f32.xlu1 %v782_v54 }
 0x1c3   :  { %v777_v55 = vpop.f32.mrf.mxu1 }
 0x1c4   :  { %v781_v56 = vsel %vm1298_vm1, %v777_v55, -inf }
 0x1c5   :  { %v785_v57 = vsel %vm287_vm2, %v781_v56, -inf }
 0x1c6   :  { %786 = vmax.xlane.f32.xlu2 %v785_v57 }
 0x1d0   :  { %661 = vrot.lane.b32.xlu0 %v1292_v26, %s1182_s7 }
 0x1d7   :  { %1035 = vrot.lane.b32.xlu1 %v1034_v58, %s1181_s6 }
 0x21d   :  { %v444_v59 = vpop.xlane.xlu1 %443 }
 0x21e   :  { %v448_v60 = vsub.f32 %v440_v35, %v444_v59 }
 0x21f   :  { %v290_v61 = vpop.xlane.xlu2 %289 }
 0x220   :  { %v450_v62 = vmul.f32 1.442695, %v448_v60  ;;  %v294_v63 = vsub.f32 %v285_v38, %v290_v61 }
 0x222   :  { %1039 = vpow2.f32 %v450_v62  ;;  %v296_v0 = vmul.f32 1.442695, %v294_v63 }
 0x224   :  { %1041 = vpow2.f32 %v296_v0 }
 0x227   :  { %v447_v1 = vpop.xlane.xlu2 %446  ;;  %v293_v2 = vpop.xlane.xlu0 %292 }
 0x228   :  { %v1331_v3 = vpop.eup %1039  ;;  %v449_v4 = vsub.f32 %v441_v41, %v447_v1  ;;  %v295_v15 = vsub.f32 %v286_v43, %v293_v2 }
 0x229   :  { %v454_v5 = vsel %vm287_vm2, %v1331_v3, 0.0 }
 0x22a   :  { %v1335_v6 = vpop.eup %1041  ;;  %v452_v7 = vmul.f32 1.442695, %v449_v4  ;;  %455 = vadd.xlane.f32.xlu2 %v454_v5  ;;  %v298_v21 = vmul.f32 1.442695, %v295_v15 }
 0x22b   :  { %v300_v8 = vsel %vm287_vm2, %v1335_v6, 0.0 }
 0x22c   :  { %1043 = vpow2.f32 %v452_v7  ;;  %301 = vadd.xlane.f32.xlu0 %v300_v8 }
 0x22f   :  { %v615_v9 = vpop.xlane.xlu2 %614  ;;  %v618_v10 = vpop.xlane.xlu0 %617 }
 0x230   :  { %v619_v11 = vsub.f32 %v611_v47, %v615_v9  ;;  %v620_v12 = vsub.f32 %v612_v49, %v618_v10 }
 0x231   :  { %v784_v13 = vpop.xlane.xlu1 %783 }
 0x232   :  { %v1339_v14 = vpop.eup %1043  ;;  %v621_v16 = vmul.f32 1.442695, %v619_v11  ;;  %v623_v17 = vmul.f32 1.442695, %v620_v12  ;;  %v788_v18 = vsub.f32 %v780_v53, %v784_v13 }
 0x233   :  { %v457_v19 = vsel %vm287_vm2, %v1339_v14, 0.0 }
 0x234   :  { %1045 = vpow2.f32 %v621_v16  ;;  %v790_v20 = vmul.f32 1.442695, %v788_v18  ;;  %458 = vadd.xlane.f32.xlu0 %v457_v19 }
 0x235   :  { %1047 = vpow2.f32 %v623_v17 }
 0x236   :  { %1049 = vpow2.f32 %v790_v20 }
 0x237   :  { %1051 = vpow2.f32 %v298_v21 }
 0x239   :  { %v787_v22 = vpop.xlane.xlu2 %786 }
 0x23a   :  { %v1343_v23 = vpop.eup %1045  ;;  %v789_v24 = vsub.f32 %v781_v56, %v787_v22 }
 0x23b   :  { %v1345_v25 = vpop.eup %1047  ;;  %v625_v27 = vsel %vm287_vm2, %v1343_v23, 0.0 }
 0x23c   :  { %v1349_v28 = vpop.eup %1049  ;;  %v792_v30 = vmul.f32 1.442695, %v789_v24  ;;  %626 = vadd.xlane.f32.xlu1 %v625_v27  ;;  %v628_v31 = vsel %vm287_vm2, %v1345_v25, 0.0 }
 0x23d   :  { %629 = vadd.xlane.f32.xlu2 %v628_v31  ;;  %v794_v32 = vsel %vm287_vm2, %v1349_v28, 0.0  ;;  %v1355_v33 = vpop.eup %1051 }
 0x23e   :  { %1053 = vpow2.f32 %v792_v30  ;;  %795 = vadd.xlane.f32.xlu0 %v794_v32  ;;  %v303_v34 = vsel %vm287_vm2, %v1355_v33, 0.0 }
 0x242   :  { %v662_v40 = vpop.permute.xlu0 %661 }
 0x244   :  { %v1359_v35 = vpop.eup %1053  ;;  %304 = vadd.xlane.f32.xlu1 %v303_v34 }
 0x245   :  { %v797_v36 = vsel %vm287_vm2, %v1359_v35, 0.0 }
 0x246   :  { %798 = vadd.xlane.f32.xlu2 %v797_v36 }
 0x249   :  { %v1036_v37 = vpop.permute.xlu1 %1035 }
 0x24a   :  { %v1038_v38 = vunpack.i.h.bf16 %v1036_v37  ;;  %v1037_v39 = vunpack.i.l.bf16 %v1036_v37 }
 0x24c   :  { %512 = vmatpush.msrb.mxu2 %v1037_v39  ;;  %539 = vmatpush.msrb.mxu3 %v1038_v38 }
 0x252   :  { %856 = vrot.lane.b32.xlu0 %v1295_v29, %s1183_s8 }
 0x25d   :  { %830 = vrot.lane.b32.xlu1 %v1292_v26, %s1183_s8 }
 0x25e   :  { %687 = vrot.lane.b32.xlu2 %v1295_v29, %s1182_s7 }
 0x29d   :  { %v456_v41 = vpop.xlane.xlu2 %455 }
 0x29e   :  { %1055 = vrcp.f32 %v456_v41  ;;  %v471_v59 = vand.u32 2147483648, %v456_v41  ;;  %vm465_vm8 = vweird.f32 %v456_v41  ;;  %v469_v60 = vand.u32 2147483647, %v456_v41 }
 0x29f   :  { %v302_v42 = vpop.xlane.xlu0 %301 }
 0x2a0   :  { %1057 = vrcp.f32 %v302_v42  ;;  %v317_v51 = vand.u32 2147483648, %v302_v42  ;;  %v315_v26 = vand.u32 2147483647, %v302_v42  ;;  %vm311_vm4 = vweird.f32 %v302_v42 }
 0x2a1   :  { %v472_v1 = vor.u32 1.1754944e-38, %v471_v59  ;;  %vm470_vm10 = vcmp.eq.f32.partialorder %v469_v60, 8.507059e+37 }
 0x2a2   :  { %v318_v54 = vor.u32 1.1754944e-38, %v317_v51  ;;  %vm316_vm6 = vcmp.eq.f32.partialorder %v315_v26, 8.507059e+37 }
 0x2a4   :  { %v1056_v43 = vpop.eup %1055 }
 0x2a5   :  { %v461_v45 = vmul.f32 %v1056_v43, %v456_v41  ;;  %vm466_vm7 = vweird.f32 %v1056_v43 }
 0x2a6   :  { %v1058_v44 = vpop.eup %1057  ;;  %vm467_vm9 = vmor %vm465_vm8, %vm466_vm7 }
 0x2a7   :  { %v307_v46 = vmul.f32 %v1058_v44, %v302_v42  ;;  %v1369_v48 = vpop.xlane.xlu0 %458  ;;  %v462_v49 = vsub.f32 1.0, %v461_v45  ;;  %vm312_vm3 = vweird.f32 %v1058_v44 }
 0x2a8   :  { %vm313_vm5 = vmor %vm311_vm4, %vm312_vm3  ;;  %v483_v26 = vand.u32 2147483647, %v1369_v48 }
 0x2a9   :  { %v308_v47 = vsub.f32 1.0, %v307_v46  ;;  %v463_v29 = vmul.f32 %v1056_v43, %v462_v49  ;;  %v485_v49 = vand.u32 2147483648, %v1369_v48 }
 0x2ab   :  { %v309_v50 = vmul.f32 %v1058_v44, %v308_v47  ;;  %v464_v58 = vadd.f32 %v1056_v43, %v463_v29 }
 0x2ad   :  { %v310_v52 = vadd.f32 %v1058_v44, %v309_v50  ;;  %v468_v63 = vsel %vm467_vm9, %v1056_v43, %v464_v58  ;;  %vm479_vm9 = vweird.f32 %v1369_v48 }
 0x2ae   :  { %v473_v8 = vsel %vm470_vm10, %v472_v1, %v468_v63 }
 0x2af   :  { %v314_v53 = vsel %vm313_vm5, %v1058_v44, %v310_v52  ;;  %v627_v55 = vpop.xlane.xlu1 %626  ;;  %v488_v15 = vmul.f32 %v1331_v3, %v473_v8 }
 0x2b0   :  { %1059 = vrcp.f32 %v627_v55  ;;  %v319_v56 = vsel %vm316_vm6, %v318_v54, %v314_v53  ;;  %v1379_v4 = vpop.xlane.xlu2 %629  ;;  %v642_v11 = vand.u32 2147483648, %v627_v55  ;;  %v640_v13 = vand.u32 2147483647, %v627_v55 }
 0x2b1   :  { %1061 = vrcp.f32 %v1369_v48  ;;  %v1372_v57 = vpop.xlane.xlu0 %795  ;;  %v334_v61 = vmul.f32 %v1335_v6, %v319_v56  ;;  %vm636_vm12 = vweird.f32 %v627_v55  ;;  %v656_v63 = vand.u32 2147483648, %v1379_v4 }
 0x2b2   :  { %1063 = vrcp.f32 %v1372_v57  ;;  %v643_v20 = vor.u32 1.1754944e-38, %v642_v11  ;;  %vm641_vm14 = vcmp.eq.f32.partialorder %v640_v13, 8.507059e+37  ;;  %vm805_vm5 = vweird.f32 %v1372_v57 }
 0x2b3   :  { %998 = vmatmul.msk.f32.vlgmr.msra.gmra.mxu2 %vm287_vm2, %v334_v61  ;;  %v809_v42 = vand.u32 2147483647, %v1372_v57  ;;  %v657_v8 = vor.u32 1.1754944e-38, %v656_v63 }
 0x2b4   :  { %682 = vmatpush.msra.mxu2 %v662_v40 }
 0x2b6   :  { %v1060_v62 = vpop.eup %1059 }
 0x2b7   :  { %v1377_v0 = vpop.eup %1061  ;;  %v632_v2 = vmul.f32 %v1060_v62, %v627_v55  ;;  %v305_v5 = vpop.xlane.xlu1 %304  ;;  %vm637_vm11 = vweird.f32 %v1060_v62 }
 0x2b8   :  { %v1381_v7 = vpop.eup %1063  ;;  %1065 = vrcp.f32 %v305_v5  ;;  %v475_v10 = vmul.f32 %v1377_v0, %v1369_v48  ;;  %vm638_vm13 = vmor %vm636_vm12, %vm637_vm11  ;;  %v331_v34 = vand.u32 2147483648, %v305_v5  ;;  %v329_v39 = vand.u32 2147483647, %v305_v5 }
 0x2b9   :  { %v633_v9 = vsub.f32 1.0, %v632_v2  ;;  %v801_v6 = vmul.f32 %v1381_v7, %v1372_v57  ;;  %1067 = vrcp.f32 %v1379_v4  ;;  %v1390_v24 = vpop.xlane.xlu2 %798  ;;  %vm480_vm1 = vweird.f32 %v1377_v0 }
 0x2ba   :  { %v476_v19 = vsub.f32 1.0, %v475_v10  ;;  %1069 = vrcp.f32 %v1390_v24  ;;  %vm806_vm3 = vweird.f32 %v1381_v7  ;;  %vm325_vm4 = vweird.f32 %v305_v5  ;;  %vm481_vm10 = vmor %vm479_vm9, %vm480_vm1 }
 0x2bb   :  { %v634_v12 = vmul.f32 %v1060_v62, %v633_v9  ;;  %v802_v17 = vsub.f32 1.0, %v801_v6  ;;  %1004 = vmatmul.msk.f32.vlgmr.msrb.gmra.mxu2 %vm287_vm2, %v488_v15  ;;  %v332_v43 = vor.u32 1.1754944e-38, %v331_v34  ;;  %vm330_vm7 = vcmp.eq.f32.partialorder %v329_v39, 8.507059e+37  ;;  %vm1411_vm8 = vmor %vm805_vm5, %vm806_vm3  ;;  %v901_v34 = vld [vmem:[#allocation8 + $0x30] sm:$0xff] }
 0x2bc   :  { %v477_v32 = vmul.f32 %v1377_v0, %v476_v19  ;;  %vm810_vm11 = vcmp.eq.f32.partialorder %v809_v42, 8.507059e+37  ;;  %v486_v48 = vor.u32 1.1754944e-38, %v485_v49  ;;  %vm484_vm12 = vcmp.eq.f32.partialorder %v483_v26, 8.507059e+37  ;;  %v897_v39 = vld [vmem:[#allocation8 + $0x10] sm:$0xff]  ;;  %v896_v42 = vld [vmem:[#allocation8 + $0x8] sm:$0xff] }
 0x2bd   :  { %v635_v16 = vadd.f32 %v1060_v62, %v634_v12  ;;  %v803_v31 = vmul.f32 %v1381_v7, %v802_v17  ;;  %v825_v6 = vand.u32 2147483648, %v1390_v24 }
 0x2be   :  { %v1066_v18 = vpop.eup %1065  ;;  %v478_v44 = vadd.f32 %v1377_v0, %v477_v32  ;;  %v904_v32 = vld [vmem:[#allocation8 + $0x48] sm:$0xff] }
 0x2bf   :  { %v639_v21 = vsel %vm638_vm13, %v1060_v62, %v635_v16  ;;  %v321_v22 = vmul.f32 %v1066_v18, %v305_v5  ;;  %v1392_v27 = vpop.eup %1067  ;;  %vm326_vm15 = vweird.f32 %v1066_v18  ;;  %v804_v40 = vadd.f32 %v1381_v7, %v803_v31  ;;  %v906_v31 = vld [vmem:[#allocation8 + $0x58] sm:$0xff] }
 0x2c0   :  { %v644_v30 = vsel %vm641_vm14, %v643_v20, %v639_v21  ;;  %v646_v37 = vmul.f32 %v1392_v27, %v1379_v4  ;;  %vm327_vm6 = vmor %vm325_vm4, %vm326_vm15  ;;  %v1070_v47 = vpop.eup %1069  ;;  %v482_v54 = vsel %vm481_vm10, %v1377_v0, %v478_v44  ;;  %vm651_vm13 = vweird.f32 %v1392_v27  ;;  %v909_v21 = vld [vmem:[#allocation8 + $0x70] sm:$0xff] }
 0x2c1   :  { %v322_v3 = vsub.f32 1.0, %v321_v22  ;;  %v659_v36 = vmul.f32 %v1343_v23, %v644_v30  ;;  %v811_v23 = vand.u32 2147483648, %v1372_v57  ;;  %v808_v52 = vsel %vm1411_vm8, %v1381_v7, %v804_v40  ;;  %v688_v57 = vpop.permute.xlu2 %687  ;;  %v910_v22 = vld [vmem:[#allocation8 + $0x78] sm:$0xff]  ;;  %932 = vmatpush.msra.mxu0 %v909_v21  ;;  %v905_v30 = vld [vmem:[#allocation8 + $0x50] sm:$0xff] }
 0x2c2   :  { %v647_v45 = vsub.f32 1.0, %v646_v37  ;;  %v815_v56 = vmul.f32 %v1070_v47, %v1390_v24  ;;  %v487_v59 = vsel %vm484_vm12, %v486_v48, %v482_v54  ;;  %vm650_vm14 = vweird.f32 %v1379_v4  ;;  %955 = vmatpush.msra.mxu1 %v910_v22  ;;  %v899_v37 = vld [vmem:[#allocation8 + $0x20] sm:$0xff]  ;;  %v898_v40 = vld [vmem:[#allocation8 + $0x18] sm:$0xff] }
 0x2c3   :  { %v323_v38 = vmul.f32 %v1066_v18, %v322_v3  ;;  %1010 = vmatmul.msk.f32.vlgmr.msra.gmra.mxu2 %vm287_vm2, %v659_v36  ;;  %v812_v53 = vor.u32 1.1754944e-38, %v811_v23  ;;  %v654_v0 = vand.u32 2147483647, %v1379_v4  ;;  %v489_v1 = vmul.f32 %v1339_v14, %v487_v59  ;;  %vm652_vm15 = vmor %vm650_vm14, %vm651_vm13  ;;  %v903_v3 = vld [vmem:[#allocation8 + $0x40] sm:$0xff]  ;;  %v902_v36 = vld [vmem:[#allocation8 + $0x38] sm:$0xff] }
 0x2c4   :  { %v648_v55 = vmul.f32 %v1392_v27, %v647_v45  ;;  %v816_v60 = vsub.f32 1.0, %v815_v56  ;;  %v857_v7 = vpop.permute.xlu0 %856  ;;  %vm820_vm3 = vweird.f32 %v1070_v47  ;;  %vm819_vm4 = vweird.f32 %v1390_v24 }
 0x2c5   :  { %v324_v41 = vadd.f32 %v1066_v18, %v323_v38  ;;  %v813_v58 = vsel %vm810_vm11, %v812_v53, %v808_v52  ;;  %vm655_vm1 = vcmp.eq.f32.partialorder %v654_v0, 8.507059e+37  ;;  %v823_v4 = vand.u32 2147483647, %v1390_v24  ;;  %vm821_vm5 = vmor %vm819_vm4, %vm820_vm3  ;;  %v907_v24 = vld [vmem:[#allocation8 + $0x60] sm:$0xff]  ;;  %v900_v38 = vld [vmem:[#allocation8 + $0x28] sm:$0xff] }
 0x2c6   :  { %v828_v62 = vmul.f32 %v1349_v28, %v813_v58  ;;  %v817_v5 = vmul.f32 %v1070_v47, %v816_v60  ;;  %v826_v11 = vor.u32 1.1754944e-38, %v825_v6  ;;  %933 = vmatpush.msra.mxu0 %v907_v24  ;;  %vm917_vm8 = vcmask 523264  }
 0x2c7   :  { %v328_v46 = vsel %vm327_vm6, %v1066_v18, %v324_v41  ;;  %vm824_vm6 = vcmp.eq.f32.partialorder %v823_v4, 8.507059e+37  ;;  %v895_v41 = vld [vmem:[#allocation8] sm:$0xff] }
 0x2c8   :  { %v333_v51 = vsel %vm330_vm7, %v332_v43, %v328_v46  ;;  %v818_v9 = vadd.f32 %v1070_v47, %v817_v5  ;;  %934 = vmatpush.msra.mxu0 %v905_v30  ;;  %vm890_vm7 = vcmask 523648  }
 0x2c9   :  { %v335_v29 = vmul.f32 %v1355_v33, %v333_v51  ;;  %v649_v33 = vadd.f32 %v1392_v27, %v648_v55  ;;  %v911_v51 = vld [vmem:[%s1464_s3] sm:$0x3] }
 0x2ca   :  { %v822_v10 = vsel %vm821_vm5, %v1070_v47, %v818_v9  ;;  %935 = vmatpush.msra.mxu0 %v903_v3  ;;  %v913_v26 = vperm.slane %v911_v51, 0  ;;  %v914_v52 = vperm.slane %v911_v51, 1 }
 0x2cb   :  { %999 = vmatmul.msk.f32.vlgmr.msra.gmra.mxu3 %vm287_vm2, %v335_v29  ;;  %v653_v2 = vsel %vm652_vm15, %v1392_v27, %v649_v33  ;;  %v827_v12 = vsel %vm824_vm6, %v826_v11, %v822_v10  ;;  %v908_v27 = vld [vmem:[#allocation8 + $0x68] sm:$0xff] }
 0x2cc   :  { %708 = vmatpush.msra.mxu3 %v688_v57  ;;  %v658_v28 = vsel %vm655_vm1, %v657_v8, %v653_v2  ;;  %v829_v13 = vmul.f32 %v1359_v35, %v827_v12  ;;  %956 = vmatpush.msra.mxu1 %v908_v27 }
 0x2cd   :  { %v660_v14 = vmul.f32 %v1345_v25, %v658_v28  ;;  %936 = vmatpush.msra.mxu0 %v901_v34 }
 0x2ce   :  { %957 = vmatpush.msra.mxu1 %v906_v31 }
 0x2cf   :  { %v831_v61 = vpop.permute.xlu1 %830  ;;  %937 = vmatpush.msra.mxu0 %v899_v37 }
 0x2d0   :  { %851 = vmatpush.msrb.mxu2 %v831_v61  ;;  %958 = vmatpush.msra.mxu1 %v904_v32 }
 0x2d1   :  { %1016 = vmatmul.msk.f32.vlgmr.msrb.gmra.mxu2 %vm287_vm2, %v828_v62  ;;  %938 = vmatpush.msra.mxu0 %v897_v39 }
 0x2d2   :  { %959 = vmatpush.msra.mxu1 %v902_v36 }
 0x2d3   :  { %1005 = vmatmul.msk.f32.vlgmr.msrb.gmra.mxu3 %vm287_vm2, %v489_v1  ;;  %939 = vmatpush.msra.mxu0 %v895_v41 }
 0x2d4   :  { %877 = vmatpush.msrb.mxu3 %v857_v7  ;;  %960 = vmatpush.msra.mxu1 %v900_v38 }
 0x2d6   :  { %961 = vmatpush.msra.mxu1 %v898_v40 }
 0x2d8   :  { %962 = vmatpush.msra.mxu1 %v896_v42 }
 0x2db   :  { %1011 = vmatmul.msk.f32.vlgmr.msra.gmra.mxu3 %vm287_vm2, %v660_v14 }
 0x2e3   :  { %1017 = vmatmul.msk.f32.vlgmr.msrb.gmra.mxu3 %vm287_vm2, %v829_v13  ;;  %vm721_vm2 = vcmask 392448  }
 0x336   :  { %v356_v15 = vpop.f32.mrf.mxu2 }
 0x337   :  { %382 = vst.msk [vmem:[#allocation2] sm:$0xff] %vm233_vm0, %v356_v15 }
 0x33e   :  { %v514_v16 = vpop.f32.mrf.mxu2 }
 0x33f   :  { %546 = vrot.lane.b32.xlu1 %v514_v16, %s1175_s24 }
 0x346   :  { %v684_v17 = vpop.f32.mrf.mxu2 }
 0x347   :  { %715 = vrot.lane.b32.xlu0 %v684_v17, %s1178_s2 }
 0x34e   :  { %v379_v25 = vpop.f32.mrf.mxu3 }
 0x34f   :  { %383 = vst.msk [vmem:[#allocation2 + $0x8] sm:$0xff] %vm233_vm0, %v379_v25  ;;  %vm552_vm0 = vcmask 261248  }
 0x354   :  { %v853_v18 = vpop.f32.mrf.mxu2 }
 0x355   :  { %884 = vrot.lane.b32.xlu2 %v853_v18, %s1179_s30 }
 0x356   :  { %v541_v19 = vpop.f32.mrf.mxu3 }
 0x357   :  { %548 = vrot.lane.b32.xlu1 %v541_v19, %s1175_s24 }
 0x35e   :  { %v710_v35 = vpop.f32.mrf.mxu3 }
 0x35f   :  { %717 = vrot.lane.b32.xlu0 %v710_v35, %s1178_s2 }
 0x366   :  { %v879_v20 = vpop.f32.mrf.mxu3 }
 0x367   :  { %886 = vrot.lane.b32.xlu2 %v879_v20, %s1179_s30 }
 0x3af   :  { %v885_v44 = vpop.permute.xlu2 %884 }
 0x3b1   :  { %v547_v23 = vpop.permute.xlu1 %546 }
 0x3b2   :  { %553 = vst.msk [vmem:[#allocation2] sm:$0xff] %vm552_vm0, %v547_v23 }
 0x3b9   :  { %v716_v43 = vpop.permute.xlu0 %715 }
 0x3ba   :  { %722 = vst.msk [vmem:[#allocation2] sm:$0xff] %vm721_vm2, %v716_v43 }
 0x3bb   :  { %891 = vst.msk [vmem:[#allocation2] sm:$0xff] %vm890_vm7, %v885_v44 }
 0x3c1   :  { %v887_v49 = vpop.permute.xlu2 %886 }
 0x3c2   :  { %v893_v45 = vld [vmem:[#allocation2] sm:$0xff] }
 0x3c3   :  { %1018 = vmatmul.msk.f32.vlgmr.msra.gmra.mxu0 %vm917_vm8, %v893_v45  ;;  %1020 = vmatmul.msk.f32.vlgmr.msra.gmra.mxu1 %vm917_vm8, %v893_v45 }
 0x3c9   :  { %v549_v46 = vpop.permute.xlu1 %548 }
 0x3ca   :  { %554 = vst.msk [vmem:[#allocation2 + $0x8] sm:$0xff] %vm552_vm0, %v549_v46 }
 0x3d1   :  { %v718_v47 = vpop.permute.xlu0 %717 }
 0x3d2   :  { %723 = vst.msk [vmem:[#allocation2 + $0x8] sm:$0xff] %vm721_vm2, %v718_v47 }
 0x3d3   :  { %892 = vst.msk [vmem:[#allocation2 + $0x8] sm:$0xff] %vm890_vm7, %v887_v49 }
 0x3da   :  { %v894_v50 = vld [vmem:[#allocation2 + $0x8] sm:$0xff] }
 0x3db   :  { %1019 = vmatmul.msk.f32.gmra.mxu0 %vm917_vm8, %v894_v50  ;;  %1021 = vmatmul.msk.f32.gmra.mxu1 %vm917_vm8, %v894_v50 }
 0x440   :  { %v941_v29 = vpop.f32.mrf.mxu0  ;;  %v964_v53 = vpop.f32.mrf.mxu1 }
 0x441   :  { %v942_v54 = vadd.f32 %v941_v29, %v913_v26  ;;  %v965_v55 = vadd.f32 %v964_v53, %v914_v52 }
 0x443   :  { %970 = vst [vmem:[#allocation9] sm:$0xff] %v942_v54 }
 0x444   :  { %971 = vst [vmem:[#allocation9 + $0x8] sm:$0xff] %v965_v55 }
 0x458   :  { %v944_v56 = vpop.f32.mrf.mxu0  ;;  %v967_v57 = vpop.f32.mrf.mxu1 }
 0x459   :  { %v945_v48 = vadd.f32 %v944_v56, %v913_v26  ;;  %v968_v58 = vadd.f32 %v967_v57, %v914_v52 }
 0x45b   :  { %972 = vst [vmem:[#allocation9 + $0x10] sm:$0xff] %v945_v48 }
 0x45c   :  { %973 = vst [vmem:[#allocation9 + $0x18] sm:$0xff] %v968_v58 }
 0x45d   :  { %986 = dma.vmem_to_hbm [thread:$0]  %s979_s12, 512, %s981_s15, [#allocation5], %s1174_s23, %s1174_s23, %s1175_s24  }
 0x45e   :  { %1171 = dma.done.wait [#allocation5], 512  }
 0x45f   :  { %1172 = vsyncadd [#allocation5], 4294966784 }
 0x460   :  { %991 = vsyncpa [#allocation4], 1 }
 0x461   :  { %992 = vsyncpa [#allocation7], 1 }
 0x462   :  { %993 = vsyncpa [#allocation5], 1 }

</bundles_post_ra>
